<compile_context>
chip_gen: v6e
topology: v6e:2x2x1
jax: 0.10.0
libtpu: 0.0.40
codegen_flags: <defaults>
</compile_context>

<pallas_src>
import functools

import jax
import jax.numpy as jnp
from jax.experimental import pallas as pl
from jax.experimental.pallas import tpu as pltpu


def _round_up(x, m):
    return ((x + m - 1) // m) * m


def _largest_tile(dim_p, cap):
    """Largest multiple of 128 that divides dim_p (a multiple of 128) and is <= cap."""
    cap = max(128, min(dim_p, cap))
    t = (cap // 128) * 128
    while dim_p % t:
        t -= 128
    return t


def _tpu_config():
    """Returns (vmem budget bytes, is_v7x-like).

    v7x: 64 MiB VMEM / 2 TensorCores -> ~48 MiB budget.
    v5e/v6e: 128 MiB VMEM / 1 TensorCore -> ~96 MiB budget.
    Unknown devices: stay conservative.
    """
    try:
        kind = jax.devices()[0].device_kind.lower()
    except Exception:
        kind = ""
    is_v7x = "7" in kind
    if is_v7x:
        return 48 * 1024 * 1024, True
    if "v5" in kind or "v6" in kind:
        return 96 * 1024 * 1024, False
    return 48 * 1024 * 1024, False


def _unpool_kernel(f_ref, u_ref, inv_ref, o_ref, acc_ref, *, tk, f_resident):
    # grid = (batch b, output-column tile j, reduction tile k); k is innermost.
    k = pl.program_id(2)

    @pl.when(k == 0)
    def _():
        acc_ref[...] = jnp.zeros_like(acc_ref)

    if f_resident:
        # features[b] lives in VMEM across the whole (j, k) loop; slice the
        # current 128-aligned reduction chunk out of the resident block.
        off = pl.multiple_of(k * tk, 128)
        f_blk = f_ref[0, :, pl.ds(off, tk)]          # (nf_p, tk) f32
    else:
        f_blk = f_ref[0]                             # (nf_p, tk) f32

    # Unroll entries are exactly 0/1 (the occ division is fused into the
    # epilogue), so the bf16 HBM stream is lossless; promote in VMEM and keep
    # a full-precision f32 MXU accumulation against the f32 features.
    acc_ref[...] += jnp.dot(f_blk, u_ref[0].astype(jnp.float32),
                            preferred_element_type=jnp.float32)

    @pl.when(k == pl.num_programs(2) - 1)
    def _():
        # 1/occ is precomputed on the host (tiny (B, U_p) array); the epilogue
        # is a single broadcast multiply (commutes with the left matmul).
        o_ref[0] = (acc_ref[...] * inv_ref[0]).astype(o_ref.dtype)


def mesh_unpool_pallas(features, groups, occurrences, unroll_target):
    """MeshUnpool.forward.

    features:    (B, nf, E) edge features
    groups:      list (one per mesh) of 0/1 group matrices, shape (<=E, <=unroll_target)
    occurrences: list (one per mesh) of occurrence vectors (counts >= 1), len <= unroll_target
    returns      (B, nf, unroll_target)
    """
    B, nf, E = features.shape
    U = unroll_target

    nf_p = _round_up(nf, 8)       # sublane alignment (f32 features / f32 output)
    E_p = _round_up(E, 128)       # reduction dim, lane aligned
    U_p = _round_up(U, 128)       # lane-dense output columns (unmasked vst)

    # ---- padded operands, each materialized exactly once --------------------
    # Dense (B, E_p, U_p) matrix of exact 0/1 entries -> bf16 is lossless and
    # halves the dominant HBM stream; pad each group straight to the final
    # padded shape (single pad+cast+stack).
    unroll = jnp.stack([
        jnp.pad(g.astype(jnp.bfloat16),
                ((0, E_p - g.shape[0]), (0, U_p - g.shape[1])))
        for g in groups], axis=0)                                  # (B, E_p, U_p) bf16

    # Host-precomputed reciprocal occurrences; padded columns get 1.0 (their
    # unroll columns are all-zero and are sliced off anyway).
    inv_occ = jnp.stack([
        jnp.pad(1.0 / jnp.maximum(o.astype(jnp.float32), 1.0),
                (0, U_p - o.shape[0]), constant_values=1.0)
        for o in occurrences], axis=0).reshape(B, 1, U_p)          # (B, 1, U_p) f32

    f = jnp.pad(features.astype(jnp.float32),
                ((0, 0), (0, nf_p - nf), (0, E_p - E)))            # (B, nf_p, E_p) f32

    # ---- per-generation tiling / VMEM budget --------------------------------
    budget, is_v7x = _tpu_config()
    tk = _largest_tile(E_p, 1024 if is_v7x else 2048)   # big tk -> fewer acc RMW steps
    tn = _largest_tile(U_p, 512 if is_v7x else 1024)    # >=256-wide for the 256^2 MXU

    # v7x shards the parallel grid axes across 2 TensorCores: make sure B==1
    # still exposes >= 2 parallel output-column blocks.
    if is_v7x and B == 1 and U_p // tn < 2 and U_p >= 256:
        tn = _largest_tile(U_p, U_p // 2)

    # Keep features[b] resident in VMEM when it fits comfortably (fetched once
    # per b instead of once per (j, k) step); otherwise stream it per k-step.
    f_resident = 2 * nf_p * E_p * 4 <= budget // 2

    def _usage(tk_, tn_):
        feats = (nf_p * E_p if f_resident else nf_p * tk_) * 4 * 2   # dbl-buffered
        return (feats
                + tk_ * tn_ * 2 * 2          # unroll bf16, dbl-buffered
                + nf_p * tn_ * 4 * 2         # output f32, dbl-buffered
                + nf_p * tn_ * 4             # accumulator scratch
                + tn_ * 4 * 2)               # 1/occ

    while _usage(tk, tn) > budget and tk > 128:
        tk = _largest_tile(E_p, tk - 128)
    while _usage(tk, tn) > budget and tn > 128:
        tn = _largest_tile(U_p, tn - 128)

    if f_resident:
        f_spec = pl.BlockSpec((1, nf_p, E_p), lambda b, j, k: (b, 0, 0))
    else:
        f_spec = pl.BlockSpec((1, nf_p, tk), lambda b, j, k: (b, 0, k))

    grid = (B, U_p // tn, E_p // tk)
    out = pl.pallas_call(
        functools.partial(_unpool_kernel, tk=tk, f_resident=f_resident),
        out_shape=jax.ShapeDtypeStruct((B, nf_p, U_p), jnp.float32),
        grid_spec=pltpu.PrefetchScalarGridSpec(
            num_scalar_prefetch=0,
            grid=grid,
            in_specs=[
                f_spec,                                                  # features
                pl.BlockSpec((1, tk, tn), lambda b, j, k: (b, k, j)),    # unroll (bf16 0/1)
                pl.BlockSpec((1, 1, tn), lambda b, j, k: (b, 0, j)),     # 1/occurrences
            ],
            out_specs=pl.BlockSpec((1, nf_p, tn), lambda b, j, k: (b, 0, j)),
            scratch_shapes=[pltpu.VMEM((nf_p, tn), jnp.float32)],
        ),
        compiler_params=pltpu.CompilerParams(
            # batch and output-column axes shard across TensorCores on v7x;
            # the reduction axis carries the accumulator -> "arbitrary".
            dimension_semantics=("parallel", "parallel", "arbitrary"),
            vmem_limit_bytes=int(budget),
        ),
    )(f, unroll, inv_occ)
    # TODO(synk): mesh.unroll_gemm() mutates host-side mesh topology (no device
    # equivalent); it does not affect the returned features and is omitted.
    # TODO(synk): for very sparse groups a scalar-prefetched gather kernel
    # (per-column parent lists in SMEM) would beat this dense matmul; the module
    # API only hands us dense group matrices, so the dense path is kept.
    return out[:, :nf, :U]


# ---------------- pure-JAX reference (mirrors the PyTorch forward) ----------------
def _mesh_unpool_ref(features, groups, occurrences, unroll_target):
    B, nf, E = features.shape
    U = unroll_target
    unroll = jnp.stack([
        jnp.pad(g.astype(jnp.float32),
                ((0, E - g.shape[0]), (0, U - g.shape[1])))
        for g in groups], 0)                                        # (B, E, U)
    occ = jnp.stack([
        jnp.pad(o.astype(jnp.float32), (0, U - o.shape[0]), constant_values=1.0)
        for o in occurrences], 0)                                   # (B, U)
    unroll = unroll / occ[:, None, :]
    return jnp.einsum('bne,beu->bnu', features, unroll)


if __name__ == "__main__":
    key = jax.random.PRNGKey(0)
    B, nf, E, unroll_target = 2, 4, 16, 24

    kf, kg = jax.random.split(key)
    features = jax.random.normal(kf, (B, nf, E), jnp.float32)

    # Synthetic per-mesh unpool groups: binary membership of each target edge in
    # an old edge's group (>=1 parent per column) and matching occurrence counts.
    # Unpadded shapes differ per mesh to exercise pad_groups / pad_occurrences.
    groups, occurrences = [], []
    unpadded = [(E - 2, unroll_target - 3), (E, unroll_target)]
    for b, (r, c) in enumerate(unpadded):
        kb = jax.random.fold_in(kg, b)
        rnd = (jax.random.uniform(kb, (r, c)) < 0.2).astype(jnp.float32)
        eye = jnp.zeros((r, c), jnp.float32).at[
            jnp.arange(c) % r, jnp.arange(c)].set(1.0)
        g = jnp.maximum(rnd, eye)
        groups.append(g)
        occurrences.append(jnp.sum(g, axis=0))      # every entry >= 1

    out = jax.block_until_ready(
        mesh_unpool_pallas(features, groups, occurrences, unroll_target))
    ref = _mesh_unpool_ref(features, groups, occurrences, unroll_target)

    assert out.shape == (B, nf, unroll_target), out.shape
    assert jnp.allclose(out, ref, atol=1e-5, rtol=1e-5), "mismatch vs reference"
    print("KERNEL_OK")
</pallas_src>

<mosaic_0001>
module attributes {stable_mosaic.version = 11 : i64} {
  func.func @_unpool_kernel(%arg0: i32, %arg1: i32, %arg2: i32, %arg3: memref<1x8x128xf32, #tpu.memory_space<vmem>>, %arg4: memref<1x128x128xbf16, #tpu.memory_space<vmem>>, %arg5: memref<1x1x128xf32, #tpu.memory_space<vmem>>, %arg6: memref<1x8x128xf32, #tpu.memory_space<vmem>>, %arg7: memref<8x128xf32, #tpu.memory_space<vmem>>) attributes {dimension_semantics = [#tpu.dimension_semantics<parallel>, #tpu.dimension_semantics<parallel>, #tpu.dimension_semantics<arbitrary>], iteration_bounds = array<i64: 2, 1, 1>, scalar_prefetch = 0 : i64, scratch_operands = 1 : i64, tpu.core_type = #tpu.core_type<tc>, window_params = [{transform_indices = @transform_0, window_bounds = array<i64: 1, 8, 128>}, {transform_indices = @transform_1, window_bounds = array<i64: 1, 128, 128>}, {transform_indices = @transform_2, window_bounds = array<i64: 1, 1, 128>}, {transform_indices = @transform_3, window_bounds = array<i64: 1, 8, 128>}]} {
    %c0_i32 = arith.constant 0 : i32
    %0 = arith.cmpi eq, %arg2, %c0_i32 : i32
    %1 = arith.extui %0 : i1 to i32
    %c0_i32_0 = arith.constant 0 : i32
    %2 = arith.cmpi ne, %1, %c0_i32_0 : i32
    scf.if %2 {
      %cst_11 = arith.constant 0.000000e+00 : f32
      %18 = vector.broadcast %cst_11 : f32 to vector<8x128xf32>
      %c0_12 = arith.constant 0 : index
      %c0_13 = arith.constant 0 : index
      %19 = vector.load %arg7[%c0_12, %c0_13] : memref<8x128xf32, #tpu.memory_space<vmem>>, vector<8x128xf32>
      tpu.vector_store %arg7[%c0_12, %c0_13], %18 {strides = array<i32>} : memref<8x128xf32, #tpu.memory_space<vmem>>, vector<8x128xf32>,
    } else {
    }
    %c128_i32 = arith.constant 128 : i32
    %3 = arith.muli %arg2, %c128_i32 : i32
    %4 = tpu.assume_multiple %3, 128 : i32
    %c0 = arith.constant 0 : index
    %c0_1 = arith.constant 0 : index
    %5 = arith.index_cast %4 : i32 to index
    %6 = vector.load %arg3[%c0, %c0_1, %5] : memref<1x8x128xf32, #tpu.memory_space<vmem>>, vector<1x8x128xf32>
    %7 = vector.shape_cast %6 : vector<1x8x128xf32> to vector<8x128xf32>
    %c0_2 = arith.constant 0 : index
    %c0_3 = arith.constant 0 : index
    %8 = vector.load %arg7[%c0_2, %c0_3] : memref<8x128xf32, #tpu.memory_space<vmem>>, vector<8x128xf32>
    %c0_4 = arith.constant 0 : index
    %c0_5 = arith.constant 0 : index
    %c0_6 = arith.constant 0 : index
    %9 = vector.load %arg4[%c0_4, %c0_5, %c0_6] : memref<1x128x128xbf16, #tpu.memory_space<vmem>>, vector<1x128x128xbf16>
    %10 = vector.shape_cast %9 : vector<1x128x128xbf16> to vector<128x128xbf16>
    %11 = arith.extf %10 : vector<128x128xbf16> to vector<128x128xf32>
    %cst = arith.constant dense<0.000000e+00> : vector<8x128xf32>
    %12 = tpu.matmul %7, %11, %cst {dimension_numbers = #tpu.dot_dimension_numbers<[1], [0], [0], [1], [0, 0, 1, 1], [], []>} : vector<8x128xf32>, vector<128x128xf32>, vector<8x128xf32> -> vector<8x128xf32>
    %13 = arith.addf %8, %12 : vector<8x128xf32>
    %c0_7 = arith.constant 0 : index
    %c0_8 = arith.constant 0 : index
    %14 = vector.load %arg7[%c0_7, %c0_8] : memref<8x128xf32, #tpu.memory_space<vmem>>, vector<8x128xf32>
    tpu.vector_store %arg7[%c0_7, %c0_8], %13 {strides = array<i32>} : memref<8x128xf32, #tpu.memory_space<vmem>>, vector<8x128xf32>,
    %c0_i32_9 = arith.constant 0 : i32
    %15 = arith.cmpi eq, %arg2, %c0_i32_9 : i32
    %16 = arith.extui %15 : i1 to i32
    %c0_i32_10 = arith.constant 0 : i32
    %17 = arith.cmpi ne, %16, %c0_i32_10 : i32
    scf.if %17 {
      %c0_11 = arith.constant 0 : index
      %c0_12 = arith.constant 0 : index
      %18 = vector.load %arg7[%c0_11, %c0_12] : memref<8x128xf32, #tpu.memory_space<vmem>>, vector<8x128xf32>
      %c0_13 = arith.constant 0 : index
      %c0_14 = arith.constant 0 : index
      %c0_15 = arith.constant 0 : index
      %19 = vector.load %arg5[%c0_13, %c0_14, %c0_15] : memref<1x1x128xf32, #tpu.memory_space<vmem>>, vector<1x1x128xf32>
      %20 = vector.shape_cast %19 : vector<1x1x128xf32> to vector<1x128xf32>
      %21 = vector.broadcast %20 : vector<1x128xf32> to vector<8x128xf32>
      %22 = arith.mulf %18, %21 : vector<8x128xf32>
      %c0_16 = arith.constant 0 : index
      %c0_17 = arith.constant 0 : index
      %c0_18 = arith.constant 0 : index
      %23 = vector.load %arg6[%c0_16, %c0_17, %c0_18] : memref<1x8x128xf32, #tpu.memory_space<vmem>>, vector<1x8x128xf32>
      %24 = vector.shape_cast %23 : vector<1x8x128xf32> to vector<8x128xf32>
      %25 = vector.shape_cast %22 : vector<8x128xf32> to vector<1x8x128xf32>
      tpu.vector_store %arg6[%c0_16, %c0_17, %c0_18], %25 {strides = array<i32>} : memref<1x8x128xf32, #tpu.memory_space<vmem>>, vector<1x8x128xf32>,
    } else {
    }
    return
  }
  func.func @transform_0(%arg0: i32, %arg1: i32, %arg2: i32) -> (i32, i32, i32) {
    %c0_i32 = arith.constant 0 : i32
    %c0_i32_0 = arith.constant 0 : i32
    %c0_i32_1 = arith.constant 0 : i32
    return %arg0, %c0_i32, %c0_i32_0 : i32, i32, i32
  }
  func.func @transform_1(%arg0: i32, %arg1: i32, %arg2: i32) -> (i32, i32, i32) {
    %c0_i32 = arith.constant 0 : i32
    return %arg0, %arg2, %arg1 : i32, i32, i32
  }
  func.func @transform_2(%arg0: i32, %arg1: i32, %arg2: i32) -> (i32, i32, i32) {
    %c0_i32 = arith.constant 0 : i32
    %c0_i32_0 = arith.constant 0 : i32
    return %arg0, %c0_i32, %arg1 : i32, i32, i32
  }
  func.func @transform_3(%arg0: i32, %arg1: i32, %arg2: i32) -> (i32, i32, i32) {
    %c0_i32 = arith.constant 0 : i32
    %c0_i32_0 = arith.constant 0 : i32
    return %arg0, %c0_i32, %arg1 : i32, i32, i32
  }
}

</mosaic_0001>

<bundles_post_ra>
// kernel: tpu_custom_call.1
= control target key start
LH: loop header
LB: loop body
LE: loop exit
PB: predicated region body
PF: predicated region fallthrough
CT: control target
= control target key end

     0   :  { %8 = vsyncpa [#allocation4], 0  ;;  %s1087_s0 = inlined_call_operand.hbm [shape: f32[2,8,128], index: 0, kind: input, shape index: {}]   ;;  %s1088_s1 = inlined_call_operand.hbm [shape: bf16[2,128,128], index: 1, kind: input, shape index: {}]   ;;  %s1089_s2 = inlined_call_operand.vmem [shape: f32[2,1,128], index: 2, kind: input, shape index: {}]   ;;  %s1090_s3 = inlined_call_operand.hbm [shape: f32[2,8,128], index: 3, kind: output, shape index: {}]  }
   0x1   :  { %10 = vsyncpa [#allocation4 + $0x1], 0 }
   0x2   :  { %11 = vsyncpa [#allocation7], 0 }
   0x3   :  { %13 = vsyncpa [#allocation7 + $0x1], 0 }
   0x4   :  { %14 = vsyncpa [#allocation5], 0 }
   0x5   :  { %16 = vsyncpa [#allocation5 + $0x1], 0  ;;  %s895_s12 = smov 0   ;;  %s897_s13 = smov 0  }
   0x6   :  { %s899_s14 = smov 0   ;;  %s901_s15 = smov 0  }
   0x7   :  { %s903_s16 = smov 0   ;;  %s905_s17 = smov 0  }
   0x8 LB: > { %s545_s18 = sadd.s32 4294967295, %s866_s17   ;;  %s546_s19 = sadd.s32 4294967294, %s866_s17   ;;  %s866_s17 = sphi %s905_s17, %s22_s17   ;;  %s862_s16 = sphi %s903_s16, %s1102_s16   ;;  %s858_s15 = sphi %s901_s15, %s1101_s15   ;;  %s854_s14 = sphi %s899_s14, %s1100_s14   ;;  %s850_s13 = sphi %s897_s13, %s1099_s13   ;;  %s846_s12 = sphi %s895_s12, %s1098_s12  }
   0x9   : > { %s41_s20 = sadd.s32 1, %s862_s16  ;;  %s48_s21 = sadd.s32 1, %s854_s14 }
   0xa   : > { %p43_p0 = scmp.ge.s32.totalorder %s41_s20, 2  ;;  %p55_p1 = scmp.ne.s32.totalorder %s854_s14, %s850_s13 }
   0xb   : > { %p56_p2 = scmp.eq.s32.totalorder %s866_s17, 0  ;;  %p61_p3 = scmp.ne.s32.totalorder %s850_s13, %s846_s12 }
   0xc   : > { %s1104_s20 = smov (%p43_p0, %s41_s20), 0  ;;  %p62_p5 = scmp.eq.s32.totalorder %s545_s18, 0 }
   0xd   : > { %p936_p4 = por %p56_p2, %p55_p1  ;;  %s45_s23 = ssub.s32 %s862_s16, %s1104_s20 }
   0xe   : > { %p145_p6 = scmp.eq.s32.totalorder %s545_s18, 1  ;;  %p46_p7 = scmp.eq.s32.totalorder %s45_s23, 0 }
   0xf   : > { %p942_p8 = por %p62_p5, %p61_p3  ;;  %p151_p10 = scmp.eq.s32.totalorder %s546_s19, 1 }
  0x10   : > { %p946_p9 = por %p145_p6, %p55_p1  ;;  %p672_p13 = scmp.lt.s32.totalorder %s866_s17, 2 }
  0x11   : > { %s951_s26 = scalar_select %p46_p7, %s854_s14, %s48_s21  }
  0x12   : > { %p953_p11 = por %p151_p10, %p61_p3  ;;  %s960_s28 = sand.u32 1, %s854_s14  }
  0x13   : > { %s549_s29 = sshll.u32 %s960_s28, 3  ;;  %s550_s30 = sshll.u32 %s862_s16, 7 }
  0x14   : > { %s180_s6 = scalar_lea.hbm %s1087_s0, %s550_s30  ;;  %s175_s7 = scalar_lea.vmem [#allocation3], %s549_s29 }
  0x15   : > { %s182_s8 = sshll.u32 %s175_s7, 4  ;;  %p969_p0 = pnand %p672_p13, %p936_p4  ;;  %s183_s8 = int_to_ptr.vmem [resolvable:$true] %s182_s8 }
  0x16   : > { %p554_p1 = scmp.ge.s32.totalorder %s866_s17, 1  ;;  %p220_p2 = scmp.lt.s32.totalorder %s866_s17, 3 }
  0x17   : > { %s172_s10 = scalar_lea.sflag [#allocation4], %s960_s28  ;;  %p728_p3 = pneg %p969_p0 }
  0x18   : > { %s739_s11 = scalar_lea.vmem %s183_s8, 128  ;;  %s868_s18 = smov [#allocation3]  }
  0x19   : > { %p740_p5 = scmp.ne.s32.totalorder %s183_s8, %s739_s11  ;;  %s744_s19 = sshll.u32 %s868_s18, 4  ;;  %s745_s19 = int_to_ptr.vmem [resolvable:$false] %s744_s19 }
  0x1a   : > { %s746_s21 = scalar_lea.vmem %s745_s19, 256  ;;  %p747_p4 = scmp.lt.s32.totalorder %s183_s8, %s745_s19 }
  0x1b   : > { %p742_p6 = pnand %p740_p5, %p728_p3  ;;  %p748_p10 = scmp.lt.s32.totalorder %s746_s21, %s739_s11 }
  0x1d   : > { %p743_p7 = pneg %p742_p6  ;;  %p749_p13 = por %p748_p10, %p747_p4 }
  0x1f   : > { %p750_p12 = pnand %p749_p13, %p743_p7 }
  0x21   : > { %753 = shalt.err (!%p750_p12)
}
  0x22   : > { %664 = dma.hbm_to_vmem [thread:$0]  (!%p969_p0), %s180_s6, 128, %s183_s8, %s172_s10  }
  0x23   : > { %p987_p5 = pnand %p554_p1, %p220_p2  ;;  %s551_s23 = sshll.u32 %s960_s28, 6 }
  0x24   : > { %s563_s29 = sshll.u32 %s862_s16, 10  ;;  %s193_s7 = scalar_lea.vmem [#allocation6], %s551_s23 }
  0x25   : > { %s202_s5 = scalar_lea.hbm %s1088_s1, %s563_s29  ;;  %s203_s11 = sshll.u32 %s193_s7, 4  ;;  %s204_s11 = int_to_ptr.vmem [resolvable:$true] %s203_s11 }
  0x26   : > { %s190_s18 = scalar_lea.sflag [#allocation7], %s960_s28  ;;  %s767_s19 = scalar_lea.vmem %s204_s11, 1024 }
  0x27   : > { %p768_p12 = scmp.ne.s32.totalorder %s204_s11, %s767_s19  ;;  %s869_s6 = smov [#allocation6]  }
  0x28   : > { %s772_s8 = sshll.u32 %s869_s6, 4  ;;  %s773_s8 = int_to_ptr.vmem [resolvable:$false] %s772_s8 }
  0x29   : > { %p770_p6 = pnand %p768_p12, %p728_p3  ;;  %s774_s10 = scalar_lea.vmem %s773_s8, 2048 }
  0x2a   : > { %p775_p1 = scmp.lt.s32.totalorder %s204_s11, %s773_s8  ;;  %p776_p2 = scmp.lt.s32.totalorder %s774_s10, %s767_s19 }
  0x2b   : > { %p771_p7 = pneg %p770_p6 }
  0x2c   : > { %p777_p4 = por %p776_p2, %p775_p1 }
  0x2e   : > { %p778_p10 = pnand %p777_p4, %p771_p7 }
  0x30   : > { %781 = shalt.err (!%p778_p10)
}
  0x31   : > { %s870_s21 = smov 64   ;;  %s871_s23 = smov 4  }
  0x32   : > { %667 = dma.hbm_to_vmem [thread:$0]  (!%p969_p0), %s202_s5, 1024, %s204_s11, %s190_s18, %s870_s21, %s870_s21, %s871_s23  }
  0x33   : > { %224 = sbr.rel (%p987_p5) target bundleno = 302 (0x12e), region = 32  ;;  %s1005_s28 = sand.u32 (!%p987_p5), 1, %s850_s13  }
  0x34   : > { %s555_s29 = sshll.u32 (!%p987_p5), %s1005_s28, 3  ;;  %s227_s30 = scalar_lea.sflag (!%p987_p5), [#allocation4], %s1005_s28 }
  0x35   : > { %s1011_s4 = scalar_lea.vmem (!%p987_p5), [#allocation3], %s555_s29 }
  0x38   : > { %833 = dma.done.wait (%p942_p8), %s227_s30, 128  }
  0x39   : > { %835 = vsyncadd (%p942_p8), %s227_s30, 4294967168  ;;  %s556_s9 = sshll.u32 %s1005_s28, 6  ;;  %s236_s22 = scalar_lea.sflag [#allocation7], %s1005_s28 }
  0x3a   : > { %s1019_s5 = scalar_lea.vmem [#allocation6], %s556_s9 }
  0x3b   : > { %837 = dma.done.wait (%p942_p8), %s236_s22, 1024  }
  0x3c   : > { %839 = vsyncadd (%p942_p8), %s236_s22, 4294966272  ;;  %v872_v0 = vmov 0.0   ;;  %vm873_vm0 = vmmov 0   ;;  %v602_v1 = vld [vmem:[%s1019_s5 + $0x38] sm:$0xff]   ;;  %v601_v2 = vld [vmem:[%s1019_s5 + $0x30] sm:$0xff]   ;;  %p274_p8 = scmp.lt.s32.totalorder %s858_s15, 1 }
  0x3d   : > { %620 = vmatprep.subr.mxu0 %v872_v0  ;;  %652 = vmatprep.mubr.msk.f32.mxu0 %vm873_vm0, %v872_v0  ;;  %v594_v3 = vunpack.c.l.bf16 %v602_v1  ;;  %v595_v4 = vunpack.c.h.bf16 %v602_v1  ;;  %v591_v5 = vunpack.c.h.bf16 %v601_v2  ;;  %v600_v6 = vld [vmem:[%s1019_s5 + $0x28] sm:$0xff]   ;;  %v590_v7 = vunpack.c.l.bf16 %v601_v2  ;;  %v599_v9 = vld [vmem:[%s1019_s5 + $0x20] sm:$0xff]   ;;  %v598_v12 = vld [vmem:[%s1019_s5 + $0x18] sm:$0xff]   ;;  %s560_s19 = sshll.u32 %s858_s15, 7  ;;  %s272_s6 = scalar_lea.vmem [#allocation8], %s555_s29 }
  0x3e   : > { %v587_v8 = vunpack.c.h.bf16 %v600_v6  ;;  %v586_v10 = vunpack.c.l.bf16 %v600_v6  ;;  %v583_v11 = vunpack.c.h.bf16 %v599_v9  ;;  %v582_v13 = vunpack.c.l.bf16 %v599_v9  ;;  %v597_v15 = vld [vmem:[%s1019_s5 + $0x10] sm:$0xff]   ;;  %v596_v18 = vld [vmem:[%s1019_s5 + $0x8] sm:$0xff]   ;;  %v565_v21 = vld [vmem:[%s1019_s5] sm:$0xff]   ;;  %s275_s24 = scalar_select %p274_p8, %s858_s15, 1 }
  0x3f   : > { %621 = vmatpush3.msra.mxu0 %v595_v4  ;;  %v579_v14 = vunpack.c.h.bf16 %v598_v12  ;;  %v578_v16 = vunpack.c.l.bf16 %v598_v12  ;;  %v575_v17 = vunpack.c.h.bf16 %v597_v15  ;;  %v574_v19 = vunpack.c.l.bf16 %v597_v15  ;;  %v289_v25 = vld [vmem:[%s1011_s4] sm:$0xff]  ;;  %s423_s8 = sshll.u32 %s272_s6, 4  ;;  %s1045_s23 = scalar_lea.hbm %s1090_s3, %s560_s19  ;;  %s424_s8 = int_to_ptr.vmem [resolvable:$true] %s423_s8 }
  0x40   : > { %622 = vmatprep.subr.mxu0 %v872_v0  ;;  %v571_v20 = vunpack.c.h.bf16 %v596_v18  ;;  %v570_v22 = vunpack.c.l.bf16 %v596_v18  ;;  %v567_v23 = vunpack.c.h.bf16 %v565_v21  ;;  %v566_v24 = vunpack.c.l.bf16 %v565_v21  ;;  %s279_s18 = scalar_lea.vmem %s1089_s2, %s275_s24  ;;  %s409_s30 = scalar_lea.sflag [#allocation5], %s1005_s28 }
  0x41   : > { %623 = vmatpush3.msra.mxu0 %v594_v3  ;;  %v558_v26 = vld [vmem:[%s279_s18] ss:$0 sm:$0xff]  ;;  %s782_s4 = scalar_lea.vmem %s424_s8, 128  ;;  %s874_s15 = smov [#allocation8]  }
  0x42   : > { %624 = vmatprep.subr.mxu0 %v872_v0  ;;  %p783_p0 = scmp.ne.s32.totalorder %s424_s8, %s782_s4  ;;  %s786_s9 = sshll.u32 %s874_s15, 4  ;;  %s787_s9 = int_to_ptr.vmem [resolvable:$false] %s786_s9 }
  0x43   : > { %625 = vmatpush3.msra.mxu0 %v591_v5  ;;  %s788_s29 = scalar_lea.vmem %s787_s9, 256  ;;  %p789_p5 = scmp.lt.s32.totalorder %s424_s8, %s787_s9 }
  0x44   : > { %626 = vmatprep.subr.mxu0 %v872_v0  ;;  %p784_p3 = pnand %p783_p0, %p946_p9  ;;  %p790_p12 = scmp.lt.s32.totalorder %s788_s29, %s782_s4 }
  0x45   : > { %627 = vmatpush3.msra.mxu0 %v590_v7 }
  0x46   : > { %628 = vmatprep.subr.mxu0 %v872_v0  ;;  %p785_p13 = pneg %p784_p3  ;;  %p791_p6 = por %p790_p12, %p789_p5 }
  0x47   : > { %629 = vmatpush3.msra.mxu0 %v587_v8 }
  0x48   : > { %630 = vmatprep.subr.mxu0 %v872_v0  ;;  %p792_p7 = pnand %p791_p6, %p785_p13 }
  0x49   : > { %631 = vmatpush3.msra.mxu0 %v586_v10 }
  0x4a   : > { %632 = vmatprep.subr.mxu0 %v872_v0 }
  0x4b   : > { %633 = vmatpush3.msra.mxu0 %v583_v11 }
  0x4c   : > { %634 = vmatprep.subr.mxu0 %v872_v0 }
  0x4d   : > { %635 = vmatpush3.msra.mxu0 %v582_v13 }
  0x4e   : > { %636 = vmatprep.subr.mxu0 %v872_v0 }
  0x4f   : > { %637 = vmatpush3.msra.mxu0 %v579_v14 }
  0x50   : > { %638 = vmatprep.subr.mxu0 %v872_v0 }
  0x51   : > { %639 = vmatpush3.msra.mxu0 %v578_v16 }
  0x52   : > { %640 = vmatprep.subr.mxu0 %v872_v0 }
  0x53   : > { %641 = vmatpush3.msra.mxu0 %v575_v17 }
  0x54   : > { %642 = vmatprep.subr.mxu0 %v872_v0 }
  0x55   : > { %643 = vmatpush3.msra.mxu0 %v574_v19 }
  0x56   : > { %644 = vmatprep.subr.mxu0 %v872_v0 }
  0x57   : > { %645 = vmatpush3.msra.mxu0 %v571_v20 }
  0x58   : > { %646 = vmatprep.subr.mxu0 %v872_v0 }
  0x59   : > { %647 = vmatpush3.msra.mxu0 %v570_v22 }
  0x5a   : > { %648 = vmatprep.subr.mxu0 %v872_v0 }
  0x5b   : > { %649 = vmatpush3.msra.mxu0 %v567_v23 }
  0x5c   : > { %650 = vmatprep.subr.mxu0 %v872_v0 }
  0x5d   : > { %651 = vmatpush3.msra.mxu0 %v566_v24 }
  0x5e   : > { %653 = vmatmul.mubr.f32.vlgmr.msra.gmra.mxu0 %v289_v25 }
 0x11e   : > { %v389_v27 = vpop.f32.mrf.mxu0 }
 0x11f   : > { %v406_v28 = vmul.f32 %v558_v26, %v389_v27 }
 0x120   : > { %v654_v29 = vpop.f32.mrf.mxu0 }
 0x121   : > { %407 = vst [vmem:[%s272_s6] sm:$0xff] %v406_v28 }
 0x122   : > { %795 = shalt.err (!%p792_p7)
}
 0x123   : > { %s796_s22 = scalar_lea.hbm %s1045_s23, 128  ;;  %s800_s24 = scalar_lea.hbm %s1090_s3, 256 }
 0x124   : > { %p797_p1 = scmp.ne.s32.totalorder %s1045_s23, %s796_s22  ;;  %p801_p10 = scmp.lt.s32.totalorder %s1045_s23, %s1090_s3 }
 0x125   : > { %p802_p8 = scmp.lt.s32.totalorder %s800_s24, %s796_s22 }
 0x126   : > { %p798_p2 = pnand %p797_p1, %p946_p9 }
 0x127   : > { %p803_p0 = por %p802_p8, %p801_p10 }
 0x128   : > { %p799_p4 = pneg %p798_p2 }
 0x12a   : > { %p804_p3 = pnand %p803_p0, %p799_p4 }
 0x12c   : > { %807 = shalt.err (!%p804_p3)
}
 0x12d   : > { %659 = dma.vmem_to_hbm [thread:$0]  (%p946_p9), %s424_s8, 128, %s1045_s23, %s409_s30  }
 0x12e PF: > { %s435_s18 = sand.u32 1, %s846_s12   ;;  %p1097_p13 = scmp.ge.s32.totalorder %s866_s17, 2 }
 0x12f   : > { %s436_s19 = scalar_lea.sflag [#allocation5], %s435_s18 }
 0x130   : > { %p669_p5 = pnand %p1097_p13, %p953_p11 }
 0x132   : > { %p670_p12 = pneg %p669_p5 }
 0x134   : > { %841 = dma.done.wait (%p670_p12), %s436_s19, 128  }
 0x135   : > { %843 = vsyncadd (%p670_p12), %s436_s19, 4294967168  ;;  %s22_s17 = sadd.s32 1, %s866_s17   ;;  %s1098_s12 = smov %s850_s13 }
 0x136   : > { %p19_p6 = scmp.ge.s32.totalorder %s22_s17, 4   ;;  %s1099_s13 = smov %s854_s14 }
 0x137   : > { %s1100_s14 = smov %s951_s26  ;;  %s1101_s15 = smov %s862_s16 }
 0x138   : > { %s1102_s16 = smov %s1104_s20  ;;  %21 = sbr.rel (!%p19_p6) target bundleno = 8 (0x8), region = 102 }
 0x13d   :  { %441 = vsyncpa [#allocation4], 1 }
 0x13e   :  { %443 = vsyncpa [#allocation4 + $0x1], 1 }
 0x13f   :  { %444 = vsyncpa [#allocation7], 1 }
 0x140   :  { %446 = vsyncpa [#allocation7 + $0x1], 1 }
 0x141   :  { %447 = vsyncpa [#allocation5], 1 }
 0x142   :  { %449 = vsyncpa [#allocation5 + $0x1], 1 }

</bundles_post_ra>
